<compile_context>
chip_gen: v7x
topology: tpu7x:2x2x1
jax: 0.10.0
libtpu: 0.0.40
codegen_flags: <defaults>
</compile_context>

<pallas_src>
import jax
import jax.numpy as jnp
from jax.experimental import pallas as pl
from jax.experimental.pallas import tpu as pltpu

ORDER = 2           # diffusion order, as in the module's default
_LANE = 128
_MAX_ROW_BLOCK = 256  # MXU-native M on v6e/v7x (128 also fine; sweep on v5e)


def _round_up(x, m):
    return ((x + m - 1) // m) * m


def _diffusion_kernel(base_ref, props_ref, z_ref, out_ref):
    """One (node-row-chunk, batch) tile per grid step.

    base_ref:  (rb, L)       f32   x + (x @ W_0) + bias  (exact-f32 residual path)
    props_ref: (rb, KD*Np)   bf16  row chunk of the 6 concatenated (A^T)^p mats
    z_ref:     (KD*Np, L)    bf16  per-batch stack of pre-conv'd feature slabs
    out_ref:   (rb, L)       f32   x + GCN(x) rows for this chunk
    """
    out_ref[...] = base_ref[...] + jnp.dot(
        props_ref[...], z_ref[...], preferred_element_type=jnp.float32)


def graph_embedding(x_bcnt, supports, w_t, bias, *, row_block=None):
    """x_bcnt: (B, C_in, N, T) float32 (PyTorch NCHW). Returns same shape."""
    B, C, N, T = x_bcnt.shape
    S = supports.shape[0]
    K = S * ORDER + 1          # 7 feature groups
    KD = S * ORDER             # 6 diffusion groups
    Cout = w_t.shape[1]
    assert Cout == C, "residual x + GCN(x) requires c_out == c_in"
    assert w_t.shape[0] == K * C

    f32 = jnp.float32

    # ---- tile sizing: row_block multiple of 16 (bf16 sublane tile), big M fill
    if row_block is None:
        row_block = _round_up(N, 16) if N <= _MAX_ROW_BLOCK else _MAX_ROW_BLOCK
    row_block = max(16, _round_up(row_block, 16))
    N_pad = _round_up(N, row_block)
    n_chunks = N_pad // row_block
    L = T * Cout
    L_pad = _round_up(L, _LANE)            # lane-dense output (no masked vst)

    # ---- layout: (B, C, N, T) -> (B, N, T, C): nodes on sublanes, (t,c) lanes
    x4 = jnp.transpose(x_bcnt.astype(f32), (0, 2, 3, 1))          # (B, N, T, C)

    # ---- hoisted 1x1 conv (f32): z_k = x contracted with the k-th weight block
    w_groups = w_t.astype(f32).reshape(K, C, Cout)                # (K, C, Cout)
    z_all = jnp.einsum("bntc,kco->kbnto", x4, w_groups)           # (K,B,N,T,Co)

    # residual + z_0 + bias folded once, kept f32 end-to-end
    base = x4 + z_all[0] + bias.astype(f32)[None, None, None, :]  # (B, N, T, Co)
    base = base.reshape(B, N, L)
    base = jnp.pad(base, ((0, 0), (0, N_pad - N), (0, L_pad - L)))

    # diffusion feature slabs, bf16, concatenated on the contraction axis
    z = z_all[1:].reshape(KD, B, N, L)
    z = jnp.pad(z, ((0, 0), (0, 0), (0, N_pad - N), (0, L_pad - L)))
    z = jnp.transpose(z, (1, 0, 2, 3)).reshape(B, KD * N_pad, L_pad)
    z = z.astype(jnp.bfloat16)                                    # (B, 6*Np, Lp)

    # ---- propagation matrices: (A_s^T)^p, pre-transposed + pre-squared, bf16
    At = jnp.transpose(supports.astype(f32), (0, 2, 1))           # (S, N, N)
    At = jnp.pad(At, ((0, 0), (0, N_pad - N), (0, N_pad - N)))
    plist = []
    for s in range(S):
        Pk = At[s]
        for _ in range(ORDER):
            plist.append(Pk)
            Pk = At[s] @ Pk
    props = jnp.stack(plist, axis=0)                              # (KD, Np, Np)
    # (Np, KD*Np): rows = destination node, lanes = (feature group, source node)
    props = jnp.transpose(props, (1, 0, 2)).reshape(N_pad, KD * N_pad)
    props = props.astype(jnp.bfloat16)

    # ---- VMEM budget (double-buffered) with headroom; capped for v7x (64 MiB)
    vmem_est = 2 * (row_block * L_pad * 4          # base
                    + row_block * KD * N_pad * 2   # props row chunk
                    + KD * N_pad * L_pad * 2       # z slab
                    + row_block * L_pad * 4)       # out
    vmem_limit = int(min(max(vmem_est + (8 << 20), 32 << 20), 64 << 20))

    out2d = pl.pallas_call(
        _diffusion_kernel,
        out_shape=jax.ShapeDtypeStruct((B, N_pad, L_pad), f32),
        grid_spec=pltpu.PrefetchScalarGridSpec(
            num_scalar_prefetch=0,
            # chunks outer, batch inner -> props row chunk resident across batch
            grid=(n_chunks, B),
            in_specs=[
                pl.BlockSpec((None, row_block, L_pad), lambda i, b: (b, i, 0)),
                pl.BlockSpec((row_block, KD * N_pad), lambda i, b: (i, 0)),
                pl.BlockSpec((None, KD * N_pad, L_pad), lambda i, b: (b, 0, 0)),
            ],
            out_specs=pl.BlockSpec((None, row_block, L_pad),
                                   lambda i, b: (b, i, 0)),
        ),
        compiler_params=pltpu.CompilerParams(
            dimension_semantics=("parallel", "parallel"),
            vmem_limit_bytes=vmem_limit,
        ),
    )(base, props, z)

    # back to NCHW: strip padding, (B,N,T,Cout) -> (B,Cout,N,T)
    out = out2d[:, :N, :L].reshape(B, N, T, Cout)
    return jnp.transpose(out, (0, 3, 1, 2)).astype(x_bcnt.dtype)


# ----------------------- parameter construction (glue) -----------------------

def make_params(key, num_nodes, c_in, c_out, apt_size=10):
    k_adj, k_nv1, k_nv2, k_w, k_b = jax.random.split(key, 5)

    # Two fixed supports: forward / backward transition matrices of a random
    # adjacency (deterministic stand-in for make_graph_inputs).
    adj = jax.random.uniform(k_adj, (num_nodes, num_nodes), dtype=jnp.float32)
    adj = adj + jnp.eye(num_nodes, dtype=jnp.float32)

    def asym_norm(a):
        return a / jnp.sum(a, axis=1, keepdims=True)

    sup_fwd = asym_norm(adj)
    sup_bwd = asym_norm(adj.T)

    # Adaptive adjacency (addaptadj=True, aptinit=None path):
    # adp = softmax(relu(nodevec1 @ nodevec2), dim=1) -- tiny, computed in JAX.
    nodevec1 = jax.random.normal(k_nv1, (num_nodes, apt_size), dtype=jnp.float32)
    nodevec2 = jax.random.normal(k_nv2, (apt_size, num_nodes), dtype=jnp.float32)
    adp = jax.nn.softmax(jax.nn.relu(nodevec1 @ nodevec2), axis=1)

    supports = jnp.stack([sup_fwd, sup_bwd, adp], axis=0)          # (3, N, N)

    c_cat = (supports.shape[0] * ORDER + 1) * c_in                 # 7 * c_in
    w = 0.1 * jax.random.normal(k_w, (c_out, c_cat), dtype=jnp.float32)
    bias = 0.01 * jax.random.normal(k_b, (c_out,), dtype=jnp.float32)
    return supports, jnp.transpose(w), bias                        # w_t: (c_cat, c_out)


def reference(x_bcnt, supports, w_t, bias):
    """Pure-JAX f32 reference matching the PyTorch GCN + residual (NCHW)."""
    feats = [x_bcnt]
    for s in range(supports.shape[0]):
        A = supports[s]
        xk = x_bcnt
        for _ in range(ORDER):
            xk = jnp.einsum("bcvt,vw->bcwt", xk, A)
            feats.append(xk)
    h = jnp.concatenate(feats, axis=1)          # (B, 7C, N, T)
    W = jnp.transpose(w_t)                      # (Cout, 7C)
    y = jnp.einsum("bknt,ok->bont", h, W) + bias[None, :, None, None]
    return x_bcnt + y


if __name__ == "__main__":
    key = jax.random.PRNGKey(0)
    k_x, k_p = jax.random.split(key)

    B, C_in, N_NODES, T = 2, 4, 16, 16   # small shapes; c_out == c_in (residual)
    x = jax.random.normal(k_x, (B, C_in, N_NODES, T), dtype=jnp.float32)

    supports, w_t, bias = make_params(k_p, N_NODES, C_in, C_in, apt_size=10)

    out = jax.block_until_ready(graph_embedding(x, supports, w_t, bias))

    ref = reference(x, supports, w_t, bias)
    assert out.shape == x.shape and out.dtype == x.dtype
    err = float(jnp.max(jnp.abs(out - ref)))
    assert jnp.allclose(out, ref, rtol=1e-2, atol=1e-2), err
    print("KERNEL_OK")
</pallas_src>

<mosaic_0001>
module attributes {stable_mosaic.version = 11 : i64} {
  func.func @_diffusion_kernel(%arg0: i32, %arg1: i32, %arg2: memref<1x16x128xf32, #tpu.memory_space<vmem>>, %arg3: memref<16x96xbf16, #tpu.memory_space<vmem>>, %arg4: memref<1x96x128xbf16, #tpu.memory_space<vmem>>, %arg5: memref<1x16x128xf32, #tpu.memory_space<vmem>>) attributes {dimension_semantics = [#tpu.dimension_semantics<parallel>, #tpu.dimension_semantics<parallel>], iteration_bounds = array<i64: 1, 2>, scalar_prefetch = 0 : i64, scratch_operands = 0 : i64, tpu.core_type = #tpu.core_type<tc>, window_params = [{transform_indices = @transform_0, window_bounds = array<i64: 1, 16, 128>}, {transform_indices = @transform_1, window_bounds = array<i64: 16, 96>}, {transform_indices = @transform_2, window_bounds = array<i64: 1, 96, 128>}, {transform_indices = @transform_3, window_bounds = array<i64: 1, 16, 128>}]} {
    %c0 = arith.constant 0 : index
    %c0_0 = arith.constant 0 : index
    %c0_1 = arith.constant 0 : index
    %0 = vector.load %arg2[%c0, %c0_0, %c0_1] : memref<1x16x128xf32, #tpu.memory_space<vmem>>, vector<1x16x128xf32>
    %1 = vector.shape_cast %0 : vector<1x16x128xf32> to vector<16x128xf32>
    %c0_2 = arith.constant 0 : index
    %c0_3 = arith.constant 0 : index
    %2 = vector.load %arg3[%c0_2, %c0_3] : memref<16x96xbf16, #tpu.memory_space<vmem>>, vector<16x96xbf16>
    %c0_4 = arith.constant 0 : index
    %c0_5 = arith.constant 0 : index
    %c0_6 = arith.constant 0 : index
    %3 = vector.load %arg4[%c0_4, %c0_5, %c0_6] : memref<1x96x128xbf16, #tpu.memory_space<vmem>>, vector<1x96x128xbf16>
    %4 = vector.shape_cast %3 : vector<1x96x128xbf16> to vector<96x128xbf16>
    %cst = arith.constant dense<0.000000e+00> : vector<16x128xf32>
    %5 = tpu.matmul %2, %4, %cst {dimension_numbers = #tpu.dot_dimension_numbers<[1], [0], [0], [1], [0, 0, 1, 1], [], []>} : vector<16x96xbf16>, vector<96x128xbf16>, vector<16x128xf32> -> vector<16x128xf32>
    %6 = arith.addf %1, %5 : vector<16x128xf32>
    %c0_7 = arith.constant 0 : index
    %c0_8 = arith.constant 0 : index
    %c0_9 = arith.constant 0 : index
    %7 = vector.load %arg5[%c0_7, %c0_8, %c0_9] : memref<1x16x128xf32, #tpu.memory_space<vmem>>, vector<1x16x128xf32>
    %8 = vector.shape_cast %7 : vector<1x16x128xf32> to vector<16x128xf32>
    %9 = vector.shape_cast %6 : vector<16x128xf32> to vector<1x16x128xf32>
    tpu.vector_store %arg5[%c0_7, %c0_8, %c0_9], %9 {strides = array<i32>} : memref<1x16x128xf32, #tpu.memory_space<vmem>>, vector<1x16x128xf32>,
    return
  }
  func.func @transform_0(%arg0: i32, %arg1: i32) -> (i32, i32, i32) {
    %c0_i32 = arith.constant 0 : i32
    %c0_i32_0 = arith.constant 0 : i32
    return %arg1, %arg0, %c0_i32 : i32, i32, i32
  }
  func.func @transform_1(%arg0: i32, %arg1: i32) -> (i32, i32) {
    %c0_i32 = arith.constant 0 : i32
    %c0_i32_0 = arith.constant 0 : i32
    return %arg0, %c0_i32 : i32, i32
  }
  func.func @transform_2(%arg0: i32, %arg1: i32) -> (i32, i32, i32) {
    %c0_i32 = arith.constant 0 : i32
    %c0_i32_0 = arith.constant 0 : i32
    %c0_i32_1 = arith.constant 0 : i32
    return %arg1, %c0_i32, %c0_i32_0 : i32, i32, i32
  }
  func.func @transform_3(%arg0: i32, %arg1: i32) -> (i32, i32, i32) {
    %c0_i32 = arith.constant 0 : i32
    %c0_i32_0 = arith.constant 0 : i32
    return %arg1, %arg0, %c0_i32 : i32, i32, i32
  }
}

</mosaic_0001>

<bundles_post_ra>
// kernel: tpu_custom_call.1
= control target key start
LH: loop header
LB: loop body
LE: loop exit
PB: predicated region body
PF: predicated region fallthrough
CT: control target
= control target key end

     0   :  { %s1146_s0 = inlined_call_operand.hbm [shape: f32[2,16,128], index: 0, kind: input, shape index: {}]   ;;  %s1147_s1 = inlined_call_operand.hbm [shape: bf16[16,96], index: 1, kind: input, shape index: {}]   ;;  %s1148_s2 = inlined_call_operand.hbm [shape: bf16[2,96,128], index: 2, kind: input, shape index: {}]   ;;  %s1149_s3 = inlined_call_operand.hbm [shape: f32[2,16,128], index: 3, kind: output, shape index: {}]  }
   0x1   :  { %1158 = sst [smem:[#allocation14_spill]] %s1146_s0 }
   0x2   :  { %8 = vsyncpa [#allocation3], 0 }
   0x3   :  { %10 = vsyncpa [#allocation3 + $0x1], 0 }
   0x4   :  { %11 = vsyncpa [#allocation6], 0 }
   0x5   :  { %12 = vsyncpa [#allocation4], 0 }
   0x6   :  { %14 = vsyncpa [#allocation4 + $0x1], 0  ;;  %s871_s12 = smov 0   ;;  %s873_s13 = smov 0  }
   0x7   :  { %s875_s14 = smov 0   ;;  %s877_s15 = smov 0  }
   0x8   :  { %s879_s16 = smov 0   ;;  %s881_s17 = smov 0  }
   0x9 LB: > { %s29_s18 = sadd.s32 1, %s833_s16  ;;  %s41_s19 = sadd.s32 1, %s825_s14  ;;  %s837_s17 = sphi %s881_s17, %s20_s17   ;;  %s833_s16 = sphi %s879_s16, %s1182_s16   ;;  %s829_s15 = sphi %s877_s15, %s1181_s15   ;;  %s825_s14 = sphi %s875_s14, %s1180_s14   ;;  %s821_s13 = sphi %s873_s13, %s1179_s13   ;;  %s817_s12 = sphi %s871_s12, %s1178_s12  }
   0xa   : > { %p30_p0 = scmp.ge.s32.totalorder %s29_s18, 2  ;;  %p48_p1 = scmp.ne.s32.totalorder %s825_s14, %s821_s13 }
   0xb   : > { %p49_p2 = scmp.eq.s32.totalorder %s837_s17, 0  ;;  %p592_p5 = scmp.lt.s32.totalorder %s837_s17, 2 }
   0xc   : > { %s1184_s18 = smov (%p30_p0, %s29_s18), 0  ;;  %s174_s21 = sand.u32 1, %s837_s17  }
   0xd   : > { %1159 = sst [smem:[#allocation13_spill]] %s1184_s18  ;;  %p50_p4 = por %p49_p2, %p48_p1 }
   0xe   : > { %s36_s20 = ssub.s32 %s833_s16, %s1184_s18  ;;  %s176_s22 = sand.u32 1, %s825_s14  }
   0xf   : > { %p39_p6 = scmp.eq.s32.totalorder %s36_s20, 0  ;;  %s538_s23 = sshll.u32 %s833_s16, 8 }
  0x10   : > { %s517_s25 = sshll.u32 %s176_s22, 4  ;;  %s1160_s0 = sld [smem:[#allocation14_spill]] }
  0x11   : > { %s919_s24 = scalar_select %p39_p6, %s825_s14, %s41_s19  }
  0x12   : > { %p926_p7 = pnand %p592_p5, %p50_p4  ;;  %s178_s30 = scalar_lea.vmem [#allocation2], %s517_s25 }
  0x13   : > { %s187_s4 = sshll.u32 %s178_s30, 4  ;;  %s932_s5 = smul.u32 48, %s176_s22  ;;  %s930_s4 = int_to_ptr.vmem [resolvable:$true] %s187_s4 }
  0x14   : > { %s1161_s29 = scalar_select %p926_p7, 1, 0 }
  0x15   : > { %s934_s6 = scalar_lea.sflag [#allocation3], %s174_s21  ;;  %p1152_p9 = pneg %p926_p7 }
  0x16   : > { %s924_s28 = scalar_lea.hbm %s1160_s0, %s538_s23  ;;  %s664_s10 = scalar_lea.hbm %s1160_s0, 512 }
  0x17   : > { %s659_s7 = scalar_lea.hbm %s924_s28, 256  ;;  %p665_p12 = scmp.lt.u32.totalorder %s924_s28, %s1160_s0 }
  0x18   : > { %p660_p8 = scmp.ne.s32.totalorder %s924_s28, %s659_s7  ;;  %p666_p13 = scmp.lt.u32.totalorder %s664_s10, %s659_s7 }
  0x19   : > { %p668_p2 = scmp.lt.u32.totalorder %s659_s7, %s924_s28 }
  0x1a   : > { %p662_p10 = pnand %p1152_p9, %p660_p8  ;;  %p667_p0 = por %p666_p13, %p665_p12 }
  0x1c   : > { %p663_p11 = pneg %p662_p10  ;;  %p669_p4 = por %p668_p2, %p667_p0 }
  0x1e   : > { %p670_p5 = pnand %p669_p4, %p663_p11 }
  0x20   : > { %673 = shalt.err (!%p670_p5)
}
  0x21   : > { %s674_s20 = scalar_lea.vmem %s930_s4, 256  ;;  %s839_s21 = smov [#allocation2]  }
  0x22   : > { %p675_p6 = scmp.ne.s32.totalorder %s930_s4, %s674_s20  ;;  %s679_s22 = sshll.u32 %s839_s21, 4  ;;  %s680_s22 = int_to_ptr.vmem [resolvable:$false] %s679_s22 }
  0x23   : > { %s681_s23 = scalar_lea.vmem %s680_s22, 512  ;;  %p682_p3 = scmp.lt.s32.totalorder %s930_s4, %s680_s22 }
  0x24   : > { %p677_p8 = pnand %p675_p6, %p1152_p9  ;;  %p683_p12 = scmp.lt.s32.totalorder %s681_s23, %s674_s20 }
  0x26   : > { %p678_p10 = pneg %p677_p8  ;;  %p684_p13 = por %p683_p12, %p682_p3 }
  0x28   : > { %p685_p0 = pnand %p684_p13, %p678_p10 }
  0x2a   : > { %688 = shalt.err (!%p685_p0)
}
  0x2b   : > { %s840_s25 = smov 128   ;;  %s841_s26 = smov 8  }
  0x2c   : > { %583 = dma.hbm_to_vmem [thread:$0]  (!%p926_p7), %s924_s28, 256, %s930_s4, %s934_s6, %s840_s25, %s840_s25, %s841_s26  }
  0x2d   : > { %s963_s27 = sadd.s32 4294967295, %s837_s17   ;;  %s513_s30 = sadd.s32 4294967294, %s837_s17  }
  0x2e   : > { %p54_p3 = scmp.ne.s32.totalorder %s821_s13, %s817_s12  ;;  %p1151_p11 = scmp.eq.s32.totalorder %s963_s27, 0 }
  0x2f   : > { %p132_p2 = scmp.eq.s32.totalorder %s963_s27, 1  ;;  %p138_p4 = scmp.eq.s32.totalorder %s513_s30, 1 }
  0x30   : > { %p514_p5 = scmp.ge.s32.totalorder %s837_s17, 1  ;;  %p973_p6 = por %p1151_p11, %p54_p3 }
  0x31   : > { %p980_p8 = por %p132_p2, %p48_p1  ;;  %p984_p10 = por %p138_p4, %p54_p3 }
  0x32   : > { %s1162_s7 = scalar_select %p973_p6, 1, 0 }
  0x33   : > { %s1163_s28 = scalar_select %p980_p8, 1, 0 }
  0x34   : > { %s1164_s4 = scalar_select %p984_p10, 1, 0 }
  0x35   : > { %p145_p12 = scmp.lt.s32.totalorder %s837_s17, 3  ;;  %s842_s9 = smov [#allocation5]  }
  0x36   : > { %s160_s10 = sshll.u32 %s842_s9, 4  ;;  %s564_s11 = smul.u32 768, %s833_s16  ;;  %s993_s10 = int_to_ptr.vmem [resolvable:$true] %s160_s10 }
  0x37   : > { %p989_p13 = pnand %p514_p5, %p145_p12  ;;  %s201_s19 = scalar_lea.vmem [#allocation7], %s932_s5 }
  0x38   : > { %s208_s20 = sshll.u32 %s201_s19, 4  ;;  %s1008_s25 = scalar_lea.hbm %s1148_s2, %s564_s11  ;;  %s1010_s20 = int_to_ptr.vmem [resolvable:$true] %s208_s20 }
  0x39   : > { %s1165_s8 = scalar_select %p989_p13, 1, 0 }
  0x3a   : > { %p576_p0 = pneg %p989_p13  ;;  %s689_s9 = scalar_lea.hbm %s1147_s1, 128 }
  0x3b   : > { %p690_p3 = scmp.ne.s32.totalorder %s1147_s1, %s689_s9  ;;  %p696_p12 = scmp.lt.u32.totalorder %s689_s9, %s1147_s1 }
  0x3c   : > { %p1001_p1 = pnand %p576_p0, %p1151_p11 }
  0x3e   : > { %p691_p2 = pneg %p1001_p1 }
  0x40   : > { %p692_p4 = pnand %p691_p2, %p690_p3 }
  0x42   : > { %p693_p5 = pneg %p692_p4 }
  0x44   : > { %p698_p0 = pnand %p696_p12, %p693_p5 }
  0x46   : > { %701 = shalt.err (!%p698_p0)
}
  0x47   : > { %s702_s11 = scalar_lea.vmem %s993_s10, 128  ;;  %p710_p8 = scmp.lt.s32.totalorder %s993_s10, %s993_s10 }
  0x48   : > { %p703_p11 = scmp.ne.s32.totalorder %s993_s10, %s702_s11  ;;  %p711_p6 = scmp.lt.s32.totalorder %s702_s11, %s702_s11 }
  0x4a   : > { %p705_p9 = pnand %p703_p11, %p691_p2  ;;  %p712_p13 = por %p711_p6, %p710_p8 }
  0x4c   : > { %p706_p10 = pneg %p705_p9 }
  0x4e   : > { %p713_p7 = pnand %p712_p13, %p706_p10 }
  0x50   : > { %716 = shalt.err (!%p713_p7)
}
  0x51   : > { %s843_s0 = smov 64   ;;  %s844_s18 = smov 4  }
  0x52   : > { %579 = dma.hbm_to_vmem [thread:$0]  (!%p1001_p1), %s1147_s1, 128, %s993_s10, [#allocation6], %s843_s0, %s843_s0, %s844_s18  }
  0x53   : > { %s717_s26 = scalar_lea.hbm %s1008_s25, 768  ;;  %p1167_p7 = scmp.ne.s32.totalorder %s1161_s29, 0 }
  0x54   : > { %p718_p9 = scmp.ne.s32.totalorder %s1008_s25, %s717_s26  ;;  %s722_s5 = scalar_lea.hbm %s1148_s2, 1536 }
  0x55   : > { %p1168_p11 = pneg %p1167_p7  ;;  %p723_p10 = scmp.lt.u32.totalorder %s1008_s25, %s1148_s2 }
  0x56   : > { %p724_p13 = scmp.lt.u32.totalorder %s722_s5, %s717_s26  ;;  %p726_p2 = scmp.lt.u32.totalorder %s717_s26, %s1008_s25 }
  0x57   : > { %p720_p6 = pnand %p718_p9, %p1168_p11 }
  0x58   : > { %p725_p3 = por %p724_p13, %p723_p10 }
  0x59   : > { %p721_p8 = pneg %p720_p6 }
  0x5a   : > { %p727_p4 = por %p726_p2, %p725_p3 }
  0x5c   : > { %p728_p5 = pnand %p727_p4, %p721_p8 }
  0x5e   : > { %731 = shalt.err (!%p728_p5)
}
  0x5f   : > { %s732_s10 = scalar_lea.vmem %s1010_s20, 768  ;;  %p1169_p12 = pmov %p1168_p11 }
  0x60   : > { %p733_p1 = scmp.ne.s32.totalorder %s1010_s20, %s732_s10  ;;  %s845_s21 = smov [#allocation7]  }
  0x61   : > { %s737_s22 = sshll.u32 %s845_s21, 4  ;;  %s738_s22 = int_to_ptr.vmem [resolvable:$false] %s737_s22 }
  0x62   : > { %p735_p0 = pnand %p733_p1, %p1169_p12  ;;  %s739_s23 = scalar_lea.vmem %s738_s22, 1536 }
  0x63   : > { %p740_p11 = scmp.lt.s32.totalorder %s1010_s20, %s738_s22  ;;  %p741_p6 = scmp.lt.s32.totalorder %s739_s23, %s732_s10 }
  0x64   : > { %p736_p9 = pneg %p735_p0 }
  0x65   : > { %p742_p10 = por %p741_p6, %p740_p11 }
  0x67   : > { %p743_p13 = pnand %p742_p10, %p736_p9 }
  0x69   : > { %746 = shalt.err (!%p743_p13)
}
  0x6a   : > { %586 = dma.hbm_to_vmem [thread:$0]  (!%p1167_p7), %s1008_s25, 768, %s1010_s20, %s934_s6, %s843_s0, %s843_s0, %s844_s18  }
  0x6b   : > { %p1170_p8 = scmp.ne.s32.totalorder %s1165_s8, 0 }
  0x6c   : > { %s222_s26 = sand.u32 (!%p1170_p8), 1, %s963_s27   ;;  %s1067_s30 = sand.u32 (!%p1170_p8), 1, %s821_s13  }
  0x6d   : > { %220 = sbr.rel (%p1170_p8) target bundleno = 380 (0x17c), region = 32  ;;  %s522_s9 = sshll.u32 (!%p1170_p8), %s1067_s30, 4 }
  0x6e   : > { %s223_s29 = scalar_lea.sflag (!%p1170_p8), [#allocation3], %s222_s26  ;;  %s1072_s5 = scalar_lea.vmem (!%p1170_p8), [#allocation2], %s522_s9 }
  0x6f   : > { %p1171_p3 = scmp.ne.s32.totalorder (!%p1170_p8), %s1162_s7, 0 }
  0x74   : > { %800 = dma.done.wait (%p1171_p3), %s223_s29, 256  }
  0x75   : > { %802 = vsyncadd (%p1171_p3), %s223_s29, 4294967040  ;;  %p1172_p7 = scmp.eq.s32.totalorder %s963_s27, 0 }
  0x77   : > { %804 = dma.done.wait (%p1172_p7), [#allocation6], 128   ;;  %p1173_p2 = pmov %p1172_p7 }
  0x78   : > { %s565_s6 = smul.u32 48, %s1067_s30 }
  0x79   : > { %806 = vsyncadd (%p1173_p2), [#allocation6], 4294967168 }
  0x7a   : > { %s239_s8 = scalar_lea.vmem [#allocation7], %s565_s6 }
  0x7b   : > { %808 = dma.done.wait (%p1171_p3), %s223_s29, 768  }
  0x7c   : > { %810 = vsyncadd (%p1171_p3), %s223_s29, 4294966528  ;;  %v846_v0 = vmov 0.0   ;;  %vm847_vm0 = vmmov 0   ;;  %v652_v1 = vld [vmem:[%s239_s8] sm:$0xff]   ;;  %v653_v2 = vld [vmem:[%s239_s8 + $0x8] sm:$0xff]   ;;  %vm328_vm1 = vcmask 785408  }
  0x7d   : > { %547 = vmatprep.subr.bf16.mxu0 %v846_v0  ;;  %559 = vmatprep.mubr.msk.bf16.mxu0 %vm847_vm0, %v846_v0  ;;  %v654_v3 = vld [vmem:[%s239_s8 + $0x10] sm:$0xff]   ;;  %v655_v4 = vld [vmem:[%s239_s8 + $0x18] sm:$0xff]   ;;  %v656_v5 = vld [vmem:[%s239_s8 + $0x20] sm:$0xff]   ;;  %s266_s27 = scalar_lea.vmem [#allocation8], %s522_s9  ;;  %s539_s20 = sshll.u32 %s829_s15, 8 }
  0x7e   : > { %548 = vmatpush3.bf16.msra.mxu0 %v652_v1  ;;  %v657_v6 = vld [vmem:[%s239_s8 + $0x28] sm:$0xff]   ;;  %v271_v8 = vld [vmem:[%s1072_s5] sm:$0xff]  ;;  %s393_s7 = sshll.u32 %s266_s27, 4  ;;  %v272_v10 = vld [vmem:[%s1072_s5 + $0x8] sm:$0xff]  ;;  %s1097_s18 = scalar_lea.hbm %s1149_s3, %s539_s20  ;;  %s1092_s7 = int_to_ptr.vmem [resolvable:$true] %s393_s7 }
  0x7f   : > { %549 = vmatprep.subr.bf16.mxu0 %v846_v0  ;;  %v658_v7 = vld [vmem:[#allocation5] sm:$0xff]   ;;  %s378_s15 = scalar_lea.sflag [#allocation4], %s1067_s30  ;;  %s747_s19 = scalar_lea.vmem %s1092_s7, 256 }
  0x80   : > { %p748_p4 = scmp.ne.s32.totalorder %s1092_s7, %s747_s19  ;;  %p1174_p5 = scmp.ne.s32.totalorder %s1163_s28, 0 }
  0x81   : > { %s848_s11 = smov [#allocation8]  }
  0x82   : > { %550 = vmatpush3.bf16.msra.mxu0 %v653_v2  ;;  %p749_p1 = pnand %p748_p4, %p1174_p5  ;;  %s751_s10 = sshll.u32 %s848_s11, 4  ;;  %s752_s10 = int_to_ptr.vmem [resolvable:$false] %s751_s10 }
  0x83   : > { %551 = vmatprep.subr.bf16.mxu0 %v846_v0  ;;  %s753_s21 = scalar_lea.vmem %s752_s10, 512  ;;  %p754_p0 = scmp.lt.s32.totalorder %s1092_s7, %s752_s10 }
  0x84   : > { %p750_p12 = pneg %p749_p1  ;;  %p755_p9 = scmp.lt.s32.totalorder %s753_s21, %s747_s19 }
  0x86   : > { %552 = vmatpush3.bf16.msra.mxu0 %v654_v3  ;;  %p756_p11 = por %p755_p9, %p754_p0 }
  0x87   : > { %553 = vmatprep.subr.bf16.mxu0 %v846_v0 }
  0x88   : > { %p757_p6 = pnand %p756_p11, %p750_p12 }
  0x8a   : > { %554 = vmatpush3.bf16.msra.mxu0 %v655_v4 }
  0x8b   : > { %555 = vmatprep.subr.bf16.mxu0 %v846_v0 }
  0x8e   : > { %556 = vmatpush3.bf16.msra.mxu0 %v656_v5 }
  0x8f   : > { %557 = vmatprep.subr.bf16.mxu0 %v846_v0 }
  0x92   : > { %558 = vmatpush3.bf16.msra.mxu0 %v657_v6 }
  0x95   : > { %560 = vmatmul.mubr.msk.bf16.vlgmr.msra.gmra.mrb[0].mxu0 %vm328_vm1, %v658_v7 }
 0x168   : > { %v366_v9 = vpop.f32.mrb[0].mxu0 }
 0x169   : > { %v373_v11 = vadd.f32 %v366_v9, %v271_v8  ;;  %v561_v12 = vpop.f32.mrb[1].mxu0 }
 0x16a   : > { %v369_v13 = vpop.f32.mrb[2].mxu0 }
 0x16b   : > { %375 = vst [vmem:[%s266_s27] sm:$0xff] %v373_v11  ;;  %v374_v14 = vadd.f32 %v369_v13, %v272_v10  ;;  %v562_v15 = vpop.f32.mrb[3].mxu0 }
 0x16d   : > { %376 = vst [vmem:[%s266_s27 + $0x8] sm:$0xff] %v374_v14 }
 0x16e   : > { %760 = shalt.err (!%p757_p6)
}
 0x16f   : > { %s761_s22 = scalar_lea.hbm %s1097_s18, 256  ;;  %s765_s9 = scalar_lea.hbm %s1149_s3, 512 }
 0x170   : > { %p762_p10 = scmp.ne.s32.totalorder %s1097_s18, %s761_s22  ;;  %p766_p3 = scmp.lt.u32.totalorder %s1097_s18, %s1149_s3 }
 0x171   : > { %p767_p7 = scmp.lt.u32.totalorder %s765_s9, %s761_s22  ;;  %p769_p4 = scmp.lt.u32.totalorder %s761_s22, %s1097_s18 }
 0x172   : > { %p763_p13 = pnand %p762_p10, %p1174_p5 }
 0x173   : > { %p768_p2 = por %p767_p7, %p766_p3 }
 0x174   : > { %p764_p8 = pneg %p763_p13 }
 0x175   : > { %p770_p1 = por %p769_p4, %p768_p2 }
 0x177   : > { %p771_p12 = pnand %p770_p1, %p764_p8 }
 0x179   : > { %774 = shalt.err (!%p771_p12)
}
 0x17a   : > { %s849_s6 = smov 128   ;;  %s850_s8 = smov 8  }
 0x17b   : > { %574 = dma.vmem_to_hbm [thread:$0]  (%p1174_p5), %s1092_s7, 256, %s1097_s18, %s378_s15, %s849_s6, %s849_s6, %s850_s8  }
 0x17c PF: > { %s408_s27 = sand.u32 1, %s817_s12   ;;  %p1175_p0 = scmp.ne.s32.totalorder %s1164_s4, 0 }
 0x17d   : > { %p1176_p9 = scmp.ge.s32.totalorder %s837_s17, 2  ;;  %s409_s20 = scalar_lea.sflag [#allocation4], %s408_s27 }
 0x17f   : > { %p588_p11 = pnand %p1176_p9, %p1175_p0 }
 0x181   : > { %812 = dma.done.wait (!%p588_p11), %s409_s20, 256  }
 0x182   : > { %814 = vsyncadd (!%p588_p11), %s409_s20, 4294967040  ;;  %s20_s17 = sadd.s32 1, %s837_s17   ;;  %s1177_s28 = sld [smem:[#allocation13_spill]] }
 0x183   : > { %p17_p6 = scmp.ge.s32.totalorder %s20_s17, 4   ;;  %s1178_s12 = smov %s821_s13 }
 0x184   : > { %s1179_s13 = smov %s825_s14  ;;  %s1180_s14 = smov %s919_s24 }
 0x185   : > { %s1181_s15 = smov %s833_s16  ;;  %19 = sbr.rel (!%p17_p6) target bundleno = 9 (0x9), region = 93 }
 0x188   : > { %s1182_s16 = smov %s1177_s28 }
 0x18c   :  { %414 = vsyncpa [#allocation3], 1 }
 0x18d   :  { %416 = vsyncpa [#allocation3 + $0x1], 1 }
 0x18e   :  { %417 = vsyncpa [#allocation6], 1 }
 0x18f   :  { %418 = vsyncpa [#allocation4], 1 }
 0x190   :  { %420 = vsyncpa [#allocation4 + $0x1], 1 }

</bundles_post_ra>
